<compile_context>
chip_gen: v5e
topology: v5e:2x2
jax: 0.10.0
libtpu: 0.0.40
codegen_flags: <defaults>
</compile_context>

<pallas_src>
import jax
import jax.numpy as jnp
from jax import lax
from jax.experimental import pallas as pl
from jax.experimental.pallas import tpu as pltpu


def _round_up(x, m):
    return (x + m - 1) // m * m


def _pick_tile(dim, target):
    """Largest multiple of 128 <= target that minimizes round_up(dim, tile) padding."""
    target = max(128, (target // 128) * 128)
    dim_al = _round_up(max(dim, 1), 128)
    if dim_al <= target:
        return dim_al
    best_t, best_pad = 128, _round_up(dim, 128)
    t = 128
    while t <= target:
        pad = _round_up(dim, t)
        if pad < best_pad or (pad == best_pad and t > best_t):
            best_t, best_pad = t, pad
        t += 128
    return best_t


def _maybe_split_for_megacore(tile, dim):
    """If the whole (parallel) dim fits in one tile, split into two tiles when it costs
    no extra padding, so the v7x megacore split has work for both TensorCores."""
    dim_al = _round_up(max(dim, 1), 128)
    if tile >= dim_al and dim_al >= 256 and (dim_al // 2) % 128 == 0:
        return dim_al // 2
    return tile


def _phase_vmem_bytes(tn, tm, cin, f_pad):
    """Rough double-buffered VMEM footprint of the heavier aggregation phase (bytes)."""
    phase_a = (2 * tn * tm * 1          # H tiles (int8)
               + 2 * tn * cin * 4       # X tiles (f32)
               + 2 * cin * f_pad * 4    # resident W
               + 2 * tm * 4             # per-edge scale
               + tm * f_pad * 4         # f32 accumulator
               + 2 * tm * f_pad * 2)    # Xe output tiles (bf16)
    phase_b = (2 * tn * tm * 1          # H tiles (int8)
               + 2 * tm * f_pad * 2     # Xe tiles (bf16)
               + 2 * tn * 4             # per-vertex degV
               + tn * f_pad * 4         # f32 accumulator
               + 2 * tn * f_pad * 4)    # Xv output tiles (f32)
    return max(phase_a, phase_b)


# ----------------------------- kernel bodies -----------------------------

def _edge_aggr_kernel(h_ref, x_ref, w_ref, scale_ref, xe_ref, acc_ref):
    # Fused projection + vertex->hyperedge aggregation:
    #   Xe = (degE * Wdiag)[:, None] * (H^T @ (X @ W));  reduction over vertex tiles (axis 1).
    k = pl.program_id(1)

    @pl.when(k == 0)
    def _():
        acc_ref[...] = jnp.zeros_like(acc_ref)

    # On-the-fly projection: (tn, Cin) @ (Cin, F_pad); tiny K, rides under the main DMA/MXU.
    xw = jnp.dot(x_ref[...], w_ref[...], preferred_element_type=jnp.float32)
    xw = xw.astype(jnp.bfloat16)

    # H^T @ XW without a pre-transposed H copy: contract the shared vertex axis (dim 0).
    h = h_ref[...].astype(jnp.bfloat16)          # int8 (0/1) storage -> exact bf16 upcast
    acc_ref[...] += lax.dot_general(
        h, xw,
        dimension_numbers=(((0,), (0,)), ((), ())),
        preferred_element_type=jnp.float32)

    @pl.when(k == pl.num_programs(1) - 1)
    def _():
        xe_ref[...] = (scale_ref[...] * acc_ref[...]).astype(xe_ref.dtype)


def _vertex_aggr_kernel(h_ref, xe_ref, degv_ref, out_ref, acc_ref):
    # Xv = degV[:, None] * (H @ Xe);  reduction over hyperedge tiles (grid axis 1).
    k = pl.program_id(1)

    @pl.when(k == 0)
    def _():
        acc_ref[...] = jnp.zeros_like(acc_ref)

    h = h_ref[...].astype(jnp.bfloat16)
    acc_ref[...] += jnp.dot(h, xe_ref[...], preferred_element_type=jnp.float32)

    @pl.when(k == pl.num_programs(1) - 1)
    def _():
        out_ref[...] = (degv_ref[...] * acc_ref[...]).astype(out_ref.dtype)


# ------------------------------- wrapper ---------------------------------

def hypergsys_hgnn_forward(X, W, H, degE, degV, Wdiag, first_aggr=True,
                           compute_dtype=jnp.bfloat16,
                           tile_v=1024, tile_e=1024):
    """X: (N, Cin) f32, W: (Cin, F) f32 (Linear weight transposed), H: (N, M) incidence,
       degE: (M,), degV: (N,), Wdiag: (M,).  Returns (N, F) f32."""
    del first_aggr  # TODO(synk): first_aggr semantics not defined in the provided snippet.
    N, Cin = X.shape
    M = H.shape[1]
    F = W.shape[1]
    f32 = jnp.float32

    # Lane-dense feature dim; divisor-aware vertex/edge tiles (minimize padding waste).
    F_pad = _round_up(F, 128)
    tn = _pick_tile(N, tile_v)
    tm = _pick_tile(M, tile_e)
    tn = _maybe_split_for_megacore(tn, N)
    tm = _maybe_split_for_megacore(tm, M)

    # Shrink tiles until the double-buffered working set fits comfortably in VMEM
    # (v7x has only 64 MiB physical per TensorCore).
    vmem_budget = 40 * 1024 * 1024
    while _phase_vmem_bytes(tn, tm, Cin, F_pad) > vmem_budget and max(tn, tm) > 128:
        if tn >= tm:
            tn = max(128, tn // 2)
        else:
            tm = max(128, tm // 2)

    N_pad = _round_up(N, tn)
    M_pad = _round_up(M, tm)

    # Prologue: fused pad + cast only (no zeros+scatter chain, no HBM transpose of H).
    # H is exact in int8 (0/1) -> half the HBM bytes on the dominant stream.
    Xp = jnp.pad(X.astype(f32), ((0, N_pad - N), (0, 0)))
    Wp = jnp.pad(W.astype(f32), ((0, 0), (0, F_pad - F)))
    Hp = jnp.pad(H.astype(jnp.int8), ((0, N_pad - N), (0, M_pad - M)))
    # Fold degE and Wdiag into a single per-edge scale (one VPU pass + one stream less).
    scaleE = jnp.pad((degE * Wdiag).astype(f32), (0, M_pad - M))[:, None]
    degVp = jnp.pad(degV.astype(f32), (0, N_pad - N))[:, None]

    vmem_limit = 56 * 1024 * 1024  # above v5e's 16 MiB default, below v7x's 64 MiB physical
    cparams = pltpu.CompilerParams(
        dimension_semantics=("parallel", "arbitrary"),
        vmem_limit_bytes=vmem_limit)

    # ---- phase A: fused projection + vertex -> hyperedge aggregation ----
    #   Xe = (degE*Wdiag)[:, None] * (H^T @ (X @ W))
    xe = pl.pallas_call(
        _edge_aggr_kernel,
        out_shape=jax.ShapeDtypeStruct((M_pad, F_pad), compute_dtype),
        grid=(M_pad // tm, N_pad // tn),                              # reduction (vertex) last
        in_specs=[pl.BlockSpec((tn, tm), lambda e, k: (k, e)),        # H block (no HTp copy)
                  pl.BlockSpec((tn, Cin), lambda e, k: (k, 0)),       # X tile (tiny Cin stream)
                  pl.BlockSpec((Cin, F_pad), lambda e, k: (0, 0)),    # W resident in VMEM
                  pl.BlockSpec((tm, 1), lambda e, k: (e, 0))],        # per-edge scale
        out_specs=pl.BlockSpec((tm, F_pad), lambda e, k: (e, 0)),
        scratch_shapes=[pltpu.VMEM((tm, F_pad), jnp.float32)],
        compiler_params=cparams,
    )(Hp, Xp, Wp, scaleE)

    # ---- phase B: hyperedge -> vertex aggregation: Xv = degV[:, None] * (H @ Xe) ----
    xv = pl.pallas_call(
        _vertex_aggr_kernel,
        out_shape=jax.ShapeDtypeStruct((N_pad, F_pad), jnp.float32),
        grid=(N_pad // tn, M_pad // tm),                              # reduction (edge) last
        in_specs=[pl.BlockSpec((tn, tm), lambda v, k: (v, k)),        # H block
                  pl.BlockSpec((tm, F_pad), lambda v, k: (k, 0)),     # Xe tile
                  pl.BlockSpec((tn, 1), lambda v, k: (v, 0))],        # per-vertex degV
        out_specs=pl.BlockSpec((tn, F_pad), lambda v, k: (v, 0)),
        scratch_shapes=[pltpu.VMEM((tn, F_pad), jnp.float32)],
        compiler_params=cparams,
    )(Hp, xe, degVp)

    return xv[:N, :F]


def reference_forward(X, W, H, degE, degV, Wdiag):
    xw = X @ W
    xe = degE[:, None] * (H.T @ xw)
    xe = Wdiag[:, None] * xe
    xv = degV[:, None] * (H @ xe)
    return xv


if __name__ == "__main__":
    # Small deterministic problem consistent with the module's forward.
    N = 16            # number of hypergraph vertices
    M = 8             # number of hyperedges
    in_channels = 8
    out_channels = 16
    heads = 1
    F = heads * out_channels

    key = jax.random.PRNGKey(0)
    k_x, k_w, k_h = jax.random.split(key, 3)

    X = jax.random.normal(k_x, (N, in_channels), dtype=jnp.float32)

    # nn.Linear(in_channels, heads*out_channels, bias=False): weight (F, Cin); we use W^T = (Cin, F)
    W = (jax.random.normal(k_w, (in_channels, F), dtype=jnp.float32)
         * (1.0 / jnp.sqrt(in_channels)))

    # Dense incidence matrix (N, M): random 0/1, guaranteed nonempty rows/cols.
    H = (jax.random.uniform(k_h, (N, M)) < 0.4).astype(jnp.float32)
    H = H.at[jnp.arange(N), jnp.arange(N) % M].set(1.0)

    # Degree normalizations (as hyperg.degE / hyperg.degV would provide).
    degE = 1.0 / jnp.maximum(H.sum(axis=0), 1.0)         # (M,)
    degV = 1.0 / jnp.maximum(H.sum(axis=1), 1.0)         # (N,)
    Wdiag = jnp.ones((M,), dtype=jnp.float32)            # torch.ones(degE.shape[0])

    out = hypergsys_hgnn_forward(X, W, H, degE, degV, Wdiag, first_aggr=True)
    out = jax.block_until_ready(out)

    ref = reference_forward(X, W, H, degE, degV, Wdiag)
    assert out.shape == (N, F)
    assert bool(jnp.all(jnp.isfinite(out)))
    # bf16 MXU operands (H exact, XW/Xe rounded) with f32 accumulation -> loose check vs f32 ref.
    assert jnp.allclose(out, ref, atol=3e-2, rtol=3e-2), "mismatch vs reference"

    print("KERNEL_OK")
</pallas_src>

<mosaic_0001>
module attributes {stable_mosaic.version = 11 : i64} {
  func.func @_edge_aggr_kernel(%arg0: i32, %arg1: i32, %arg2: memref<128x128xi8, #tpu.memory_space<vmem>>, %arg3: memref<128x8xf32, #tpu.memory_space<vmem>>, %arg4: memref<8x128xf32, #tpu.memory_space<vmem>>, %arg5: memref<128x1xf32, #tpu.memory_space<vmem>>, %arg6: memref<128x128xbf16, #tpu.memory_space<vmem>>, %arg7: memref<128x128xf32, #tpu.memory_space<vmem>>) attributes {dimension_semantics = [#tpu.dimension_semantics<parallel>, #tpu.dimension_semantics<arbitrary>], iteration_bounds = array<i64: 1, 1>, scalar_prefetch = 0 : i64, scratch_operands = 1 : i64, tpu.core_type = #tpu.core_type<tc>, window_params = [{transform_indices = @transform_0, window_bounds = array<i64: 128, 128>}, {transform_indices = @transform_1, window_bounds = array<i64: 128, 8>}, {pipeline_mode = #tpu.pipeline_mode<synchronous>, transform_indices = @transform_2, window_bounds = array<i64: 8, 128>}, {transform_indices = @transform_3, window_bounds = array<i64: 128, 1>}, {transform_indices = @transform_4, window_bounds = array<i64: 128, 128>}]} {
    %c0_i32 = arith.constant 0 : i32
    %0 = arith.cmpi eq, %arg1, %c0_i32 : i32
    %1 = arith.extui %0 : i1 to i32
    %c0_i32_0 = arith.constant 0 : i32
    %2 = arith.cmpi ne, %1, %c0_i32_0 : i32
    scf.if %2 {
      %cst_13 = arith.constant 0.000000e+00 : f32
      %16 = vector.broadcast %cst_13 : f32 to vector<128x128xf32>
      %c0_14 = arith.constant 0 : index
      %c0_15 = arith.constant 0 : index
      %17 = vector.load %arg7[%c0_14, %c0_15] : memref<128x128xf32, #tpu.memory_space<vmem>>, vector<128x128xf32>
      tpu.vector_store %arg7[%c0_14, %c0_15], %16 {strides = array<i32>} : memref<128x128xf32, #tpu.memory_space<vmem>>, vector<128x128xf32>,
    } else {
    }
    %c0 = arith.constant 0 : index
    %c0_1 = arith.constant 0 : index
    %3 = vector.load %arg3[%c0, %c0_1] : memref<128x8xf32, #tpu.memory_space<vmem>>, vector<128x8xf32>
    %c0_2 = arith.constant 0 : index
    %c0_3 = arith.constant 0 : index
    %4 = vector.load %arg4[%c0_2, %c0_3] : memref<8x128xf32, #tpu.memory_space<vmem>>, vector<8x128xf32>
    %cst = arith.constant dense<0.000000e+00> : vector<128x128xf32>
    %5 = tpu.matmul %3, %4, %cst {dimension_numbers = #tpu.dot_dimension_numbers<[1], [0], [0], [1], [0, 0, 1, 1], [], []>} : vector<128x8xf32>, vector<8x128xf32>, vector<128x128xf32> -> vector<128x128xf32>
    %6 = arith.truncf %5 : vector<128x128xf32> to vector<128x128xbf16>
    %c0_4 = arith.constant 0 : index
    %c0_5 = arith.constant 0 : index
    %7 = vector.load %arg2[%c0_4, %c0_5] : memref<128x128xi8, #tpu.memory_space<vmem>>, vector<128x128xi8>
    %8 = arith.sitofp %7 : vector<128x128xi8> to vector<128x128xbf16>
    %c0_6 = arith.constant 0 : index
    %c0_7 = arith.constant 0 : index
    %9 = vector.load %arg7[%c0_6, %c0_7] : memref<128x128xf32, #tpu.memory_space<vmem>>, vector<128x128xf32>
    %cst_8 = arith.constant dense<0.000000e+00> : vector<128x128xf32>
    %10 = tpu.matmul %8, %6, %cst_8 {dimension_numbers = #tpu.dot_dimension_numbers<[0], [0], [1], [1], [0, 1, 1, 1], [], []>} : vector<128x128xbf16>, vector<128x128xbf16>, vector<128x128xf32> -> vector<128x128xf32>
    %11 = arith.addf %9, %10 : vector<128x128xf32>
    %c0_9 = arith.constant 0 : index
    %c0_10 = arith.constant 0 : index
    %12 = vector.load %arg7[%c0_9, %c0_10] : memref<128x128xf32, #tpu.memory_space<vmem>>, vector<128x128xf32>
    tpu.vector_store %arg7[%c0_9, %c0_10], %11 {strides = array<i32>} : memref<128x128xf32, #tpu.memory_space<vmem>>, vector<128x128xf32>,
    %c0_i32_11 = arith.constant 0 : i32
    %13 = arith.cmpi eq, %arg1, %c0_i32_11 : i32
    %14 = arith.extui %13 : i1 to i32
    %c0_i32_12 = arith.constant 0 : i32
    %15 = arith.cmpi ne, %14, %c0_i32_12 : i32
    scf.if %15 {
      %c0_13 = arith.constant 0 : index
      %c0_14 = arith.constant 0 : index
      %16 = vector.load %arg5[%c0_13, %c0_14] : memref<128x1xf32, #tpu.memory_space<vmem>>, vector<128x1xf32>
      %c0_15 = arith.constant 0 : index
      %c0_16 = arith.constant 0 : index
      %17 = vector.load %arg7[%c0_15, %c0_16] : memref<128x128xf32, #tpu.memory_space<vmem>>, vector<128x128xf32>
      %18 = vector.broadcast %16 : vector<128x1xf32> to vector<128x128xf32>
      %19 = arith.mulf %18, %17 : vector<128x128xf32>
      %20 = arith.truncf %19 : vector<128x128xf32> to vector<128x128xbf16>
      %c0_17 = arith.constant 0 : index
      %c0_18 = arith.constant 0 : index
      %21 = vector.load %arg6[%c0_17, %c0_18] : memref<128x128xbf16, #tpu.memory_space<vmem>>, vector<128x128xbf16>
      tpu.vector_store %arg6[%c0_17, %c0_18], %20 {strides = array<i32>} : memref<128x128xbf16, #tpu.memory_space<vmem>>, vector<128x128xbf16>,
    } else {
    }
    return
  }
  func.func @transform_0(%arg0: i32, %arg1: i32) -> (i32, i32) {
    %c0_i32 = arith.constant 0 : i32
    return %arg1, %arg0 : i32, i32
  }
  func.func @transform_1(%arg0: i32, %arg1: i32) -> (i32, i32) {
    %c0_i32 = arith.constant 0 : i32
    %c0_i32_0 = arith.constant 0 : i32
    return %arg1, %c0_i32 : i32, i32
  }
  func.func @transform_2(%arg0: i32, %arg1: i32) -> (i32, i32) {
    %c0_i32 = arith.constant 0 : i32
    %c0_i32_0 = arith.constant 0 : i32
    %c0_i32_1 = arith.constant 0 : i32
    return %c0_i32, %c0_i32_0 : i32, i32
  }
  func.func @transform_3(%arg0: i32, %arg1: i32) -> (i32, i32) {
    %c0_i32 = arith.constant 0 : i32
    %c0_i32_0 = arith.constant 0 : i32
    return %arg0, %c0_i32 : i32, i32
  }
  func.func @transform_4(%arg0: i32, %arg1: i32) -> (i32, i32) {
    %c0_i32 = arith.constant 0 : i32
    %c0_i32_0 = arith.constant 0 : i32
    return %arg0, %c0_i32 : i32, i32
  }
}

</mosaic_0001>

<bundles_post_ra>
// kernel: tpu_custom_call.1
= control target key start
LH: loop header
LB: loop body
LE: loop exit
PB: predicated region body
PF: predicated region fallthrough
CT: control target
= control target key end

     0   :  { %vm55_vm0 = vcmask 64512   ;;  %s792_s0 = inlined_call_operand.vmem [shape: s8[128,128], index: 0, kind: input, shape index: {}]   ;;  %s793_s1 = inlined_call_operand.vmem [shape: f32[128,8], index: 1, kind: input, shape index: {}]   ;;  %s794_s2 = inlined_call_operand.vmem [shape: f32[8,128], index: 2, kind: input, shape index: {}]   ;;  %s795_s3 = inlined_call_operand.vmem [shape: f32[128,1], index: 3, kind: input, shape index: {}]   ;;  %s796_s4 = inlined_call_operand.hbm [shape: bf16[128,128], index: 4, kind: output, shape index: {}]  }
   0x1   :  { %v54_v0 = vld [vmem:[%s794_s2] sm:$0xff]  ;;  %v48_v2 = vld [vmem:[%s793_s1 + $0x50] sm:$0xff] }
   0x2   :  { %v38_v1 = vld [vmem:[%s793_s1] sm:$0xff]  ;;  %119 = vmatpush.msra.mxu0 %v54_v0  ;;  %578 = vmatpush.msra.mxu3 %v54_v0 }
   0x3   :  { %v177_v3 = vld [vmem:[%s792_s0] sm:$0xff]  ;;  %515 = vmatmul.msk.f32.vlgmr.msra.gmra.mxu0 %vm55_vm0, %v38_v1  ;;  %525 = vmatmul.msk.f32.vlgmr.msra.gmra.mxu3 %vm55_vm0, %v48_v2 }
   0x4   :  { %v181_v4 = vunpack.c.0.s8 %v177_v3  ;;  %v182_v5 = vunpack.c.1.s8 %v177_v3 }
   0x6   :  { %v197_v6 = vcvt.s32.f32 %v181_v4  ;;  %v198_v7 = vcvt.s32.f32 %v182_v5 }
   0x7   :  { %9 = vsyncpa [#allocation4], 0  ;;  %v39_v9 = vld [vmem:[%s793_s1 + $0x8] sm:$0xff]  ;;  %v49_v10 = vld [vmem:[%s793_s1 + $0x58] sm:$0xff]  ;;  %v183_v11 = vunpack.c.2.s8 %v177_v3  ;;  %v184_v12 = vunpack.c.3.s8 %v177_v3  ;;  %s503_s7 = sshll.u32 %s796_s4, 4  ;;  %s630_s8 = smov 64   ;;  %s504_s7 = int_to_ptr.hbm [resolvable:$true] %s503_s7 }
   0x8   :  { %v213_v8 = vpack.c.bf16 %v198_v7, %v197_v6  ;;  %v40_v13 = vld [vmem:[%s793_s1 + $0x10] sm:$0xff]  ;;  %v50_v14 = vld [vmem:[%s793_s1 + $0x60] sm:$0xff]  ;;  %v41_v18 = vld [vmem:[%s793_s1 + $0x18] sm:$0xff]  ;;  %s631_s9 = smov 4  }
   0x9   :  { %v199_v15 = vcvt.s32.f32 %v183_v11  ;;  %v200_v16 = vcvt.s32.f32 %v184_v12  ;;  %v51_v19 = vld [vmem:[%s793_s1 + $0x68] sm:$0xff]  ;;  %v42_v23 = vld [vmem:[%s793_s1 + $0x20] sm:$0xff]  ;;  %v52_v24 = vld [vmem:[%s793_s1 + $0x70] sm:$0xff] }
   0xa   :  { %237 = vxpose.xlu0.c.b16.start [1/8] %v213_v8, 128  ;;  %v178_v20 = vld [vmem:[%s792_s0 + $0x8] sm:$0xff]  ;;  %v53_v29 = vld [vmem:[%s793_s1 + $0x78] sm:$0xff]  ;;  %v44_v32 = vld [vmem:[%s793_s1 + $0x30] sm:$0xff] }
   0xb   :  { %516 = vmatmul.msk.f32.gmra.mxu0 %vm55_vm0, %v39_v9  ;;  %526 = vmatmul.msk.f32.gmra.mxu3 %vm55_vm0, %v49_v10  ;;  %v214_v17 = vpack.c.bf16 %v200_v16, %v199_v15  ;;  %v185_v21 = vunpack.c.0.s8 %v178_v20  ;;  %v186_v22 = vunpack.c.1.s8 %v178_v20  ;;  %v43_v28 = vld [vmem:[%s793_s1 + $0x28] sm:$0xff]  ;;  %v187_v30 = vunpack.c.2.s8 %v178_v20  ;;  %v45_v36 = vld [vmem:[%s793_s1 + $0x38] sm:$0xff]  ;;  %v179_v37 = vld [vmem:[%s792_s0 + $0x10] sm:$0xff] }
   0xc   :  { %v188_v31 = vunpack.c.3.s8 %v178_v20  ;;  %v189_v38 = vunpack.c.0.s8 %v179_v37  ;;  %v190_v39 = vunpack.c.1.s8 %v179_v37  ;;  %v46_v40 = vld [vmem:[%s793_s1 + $0x40] sm:$0xff]  ;;  %v47_v44 = vld [vmem:[%s793_s1 + $0x48] sm:$0xff]  ;;  %v191_v45 = vunpack.c.2.s8 %v179_v37  ;;  %v180_v50 = vld [vmem:[%s792_s0 + $0x18] sm:$0xff] }
   0xd   :  { %v201_v25 = vcvt.s32.f32 %v185_v21  ;;  %v202_v26 = vcvt.s32.f32 %v186_v22  ;;  %v203_v33 = vcvt.s32.f32 %v187_v30  ;;  %v192_v46 = vunpack.c.3.s8 %v179_v37  ;;  %v337_v9 = vld [vmem:[%s795_s3] sm:$0xff]  ;;  %v338_v15 = vld [vmem:[%s795_s3 + $0x8] sm:$0xff]  ;;  %v339_v20 = vld [vmem:[%s795_s3 + $0x10] sm:$0xff] }
   0xe   :  { %v204_v34 = vcvt.s32.f32 %v188_v31  ;;  %v205_v41 = vcvt.s32.f32 %v189_v38  ;;  %v206_v42 = vcvt.s32.f32 %v190_v39  ;;  %v207_v47 = vcvt.s32.f32 %v191_v45  ;;  %v343_v21 = vld [vmem:[%s795_s3 + $0x30] sm:$0xff]  ;;  %v342_v31 = vld [vmem:[%s795_s3 + $0x28] sm:$0xff]  ;;  %v348_v39 = vld [vmem:[%s795_s3 + $0x58] sm:$0xff] }
   0xf   :  { %v215_v27 = vpack.c.bf16 %v202_v26, %v201_v25  ;;  %v208_v48 = vcvt.s32.f32 %v192_v46  ;;  %v193_v51 = vunpack.c.0.s8 %v180_v50  ;;  %v194_v52 = vunpack.c.1.s8 %v180_v50  ;;  %v340_v26 = vld [vmem:[%s795_s3 + $0x18] sm:$0xff]  ;;  %v346_v37 = vld [vmem:[%s795_s3 + $0x48] sm:$0xff]  ;;  %v351_v38 = vld [vmem:[%s795_s3 + $0x70] sm:$0xff] }
  0x10   :  { %v216_v35 = vpack.c.bf16 %v204_v34, %v203_v33  ;;  %v217_v43 = vpack.c.bf16 %v206_v42, %v205_v41  ;;  %v195_v56 = vunpack.c.2.s8 %v180_v50  ;;  %v196_v57 = vunpack.c.3.s8 %v180_v50  ;;  %v344_v34 = vld [vmem:[%s795_s3 + $0x38] sm:$0xff]  ;;  %v350_v41 = vld [vmem:[%s795_s3 + $0x68] sm:$0xff] }
  0x11   :  { %v218_v49 = vpack.c.bf16 %v208_v48, %v207_v47  ;;  %v209_v53 = vcvt.s32.f32 %v193_v51  ;;  %v210_v54 = vcvt.s32.f32 %v194_v52  ;;  %v628_v10 = vmov 0   ;;  %v352_v42 = vld [vmem:[%s795_s3 + $0x78] sm:$0xff] }
  0x12   :  { %v211_v58 = vcvt.s32.f32 %v195_v56  ;;  %v212_v59 = vcvt.s32.f32 %v196_v57  ;;  %599 = vset.pattern.permute.xlu1 %v628_v10  ;;  %600 = vset.pattern.permute.xlu2 %v628_v10 }
  0x13   :  { %517 = vmatmul.msk.f32.gmra.mxu0 %vm55_vm0, %v40_v13  ;;  %527 = vmatmul.msk.f32.gmra.mxu3 %vm55_vm0, %v50_v14  ;;  %v219_v55 = vpack.c.bf16 %v210_v54, %v209_v53 }
  0x14   :  { %v220_v60 = vpack.c.bf16 %v212_v59, %v211_v58  ;;  %371 = vperm.xlu1 %599, %v337_v9   ;;  %381 = vperm.xlu2 %600, %v339_v20  }
  0x1a   :  { %238 = vxpose.xlu0.c.b16.cont [2/8] %v214_v17, 128 }
  0x1b   :  { %518 = vmatmul.msk.f32.gmra.mxu0 %vm55_vm0, %v41_v18  ;;  %528 = vmatmul.msk.f32.gmra.mxu3 %vm55_vm0, %v51_v19  ;;  %v341_v18 = vld [vmem:[%s795_s3 + $0x20] sm:$0xff] }
  0x1c   :  { %376 = vperm.xlu1 %599, %v338_v15   ;;  %386 = vperm.xlu2 %600, %v340_v26  }
  0x23   :  { %519 = vmatmul.msk.f32.gmra.mxu0 %vm55_vm0, %v42_v23  ;;  %529 = vmatmul.msk.f32.gmra.mxu3 %vm55_vm0, %v52_v24 }
  0x24   :  { %391 = vperm.xlu1 %599, %v341_v18   ;;  %396 = vperm.xlu2 %600, %v342_v31  }
  0x2a   :  { %239 = vxpose.xlu0.c.b16.cont [3/8] %v215_v27, 128  ;;  %v345_v27 = vld [vmem:[%s795_s3 + $0x40] sm:$0xff] }
  0x2b   :  { %520 = vmatmul.msk.f32.gmra.mxu0 %vm55_vm0, %v43_v28  ;;  %530 = vmatmul.msk.f32.gmra.mxu3 %vm55_vm0, %v53_v29 }
  0x2c   :  { %401 = vperm.xlu1 %599, %v343_v21   ;;  %406 = vperm.xlu2 %600, %v344_v34  }
  0x33   :  { %521 = vmatmul.msk.f32.gmra.mxu0 %vm55_vm0, %v44_v32  ;;  %v347_v32 = vld [vmem:[%s795_s3 + $0x50] sm:$0xff] }
  0x34   :  { %411 = vperm.xlu1 %599, %v345_v27   ;;  %416 = vperm.xlu2 %600, %v346_v37  }
  0x3a   :  { %240 = vxpose.xlu0.c.b16.cont [4/8] %v216_v35, 128  ;;  %v349_v35 = vld [vmem:[%s795_s3 + $0x60] sm:$0xff]  ;;  %s629_s3 = smov [#allocation3]  }
  0x3b   :  { %522 = vmatmul.msk.f32.gmra.mxu0 %vm55_vm0, %v45_v36  ;;  %s501_s30 = sshll.u32 %s629_s3, 4  ;;  %s502_s30 = int_to_ptr.vmem [resolvable:$true] %s501_s30 }
  0x3c   :  { %421 = vperm.xlu1 %599, %v347_v32   ;;  %426 = vperm.xlu2 %600, %v348_v39  }
  0x43   :  { %523 = vmatmul.msk.f32.gmra.mxu0 %vm55_vm0, %v46_v40 }
  0x44   :  { %431 = vperm.xlu1 %599, %v349_v35   ;;  %436 = vperm.xlu2 %600, %v350_v41  }
  0x4a   :  { %241 = vxpose.xlu0.c.b16.cont [5/8] %v217_v43, 128 }
  0x4b   :  { %524 = vmatmul.msk.f32.gmra.mxu0 %vm55_vm0, %v47_v44 }
  0x4c   :  { %441 = vperm.xlu1 %599, %v351_v38   ;;  %446 = vperm.xlu2 %600, %v352_v42  }
  0x5a   :  { %242 = vxpose.xlu0.c.b16.cont [6/8] %v218_v49, 128 }
  0x6a   :  { %243 = vxpose.xlu0.c.b16.cont [7/8] %v219_v55, 128 }
  0x6e   :  { %v382_v47 = vpop.permute.xlu2 %381 }
  0x76   :  { %v387_v50 = vpop.permute.xlu2 %386 }
  0x7a   :  { %244 = vxpose.xlu0.c.b16.end [8/8] %v220_v60, 128 }
  0x7e   :  { %v397_v56 = vpop.permute.xlu2 %396 }
  0x80   :  { %v121_v61 = vpop.f32.mrf.mxu0 }
  0x86   :  { %v151_v62 = vpop.f32.mrf.mxu3  ;;  %v372_v46 = vpop.permute.xlu1 %371 }
  0x88   :  { %v124_v63 = vpop.f32.mrf.mxu0 }
  0x89   :  { %v736_v0 = vpack.c.bf16 %v124_v63, %v121_v61  ;;  %v407_v61 = vpop.permute.xlu2 %406 }
  0x8e   :  { %v154_v1 = vpop.f32.mrf.mxu3  ;;  %v377_v48 = vpop.permute.xlu1 %376 }
  0x8f   :  { %v174_v16 = vpack.c.bf16 %v154_v1, %v151_v62 }
  0x90   :  { %v127_v2 = vpop.f32.mrf.mxu0 }
  0x96   :  { %v157_v3 = vpop.f32.mrf.mxu3  ;;  %v392_v54 = vpop.permute.xlu1 %391 }
  0x98   :  { %v130_v4 = vpop.f32.mrf.mxu0 }
  0x99   :  { %v170_v30 = vpack.c.bf16 %v130_v4, %v127_v2 }
  0x9e   :  { %v160_v5 = vpop.f32.mrf.mxu3  ;;  %v402_v59 = vpop.permute.xlu1 %401 }
  0x9f   :  { %v175_v14 = vpack.c.bf16 %v160_v5, %v157_v3 }
  0xa0   :  { %v133_v6 = vpop.f32.mrf.mxu0 }
  0xa6   :  { %v163_v7 = vpop.f32.mrf.mxu3 }
  0xa8   :  { %v136_v8 = vpop.f32.mrf.mxu0 }
  0xa9   :  { %v171_v28 = vpack.c.bf16 %v136_v8, %v133_v6  ;;  %v412_v8 = vpop.permute.xlu1 %411 }
  0xae   :  { %v166_v11 = vpop.f32.mrf.mxu3 }
  0xaf   :  { %v176_v12 = vpack.c.bf16 %v166_v11, %v163_v7  ;;  %v417_v7 = vpop.permute.xlu2 %416 }
  0xb0   :  { %v139_v13 = vpop.f32.mrf.mxu0 }
  0xb1   :  { %253 = vmatpush.bf16.msra.mxu1 %v176_v12  ;;  %579 = vmatpush.bf16.msra.mxu2 %v176_v12 }
  0xb2   :  { %580 = vmatpush.bf16.msrb.mxu3 %v176_v12 }
  0xb5   :  { %254 = vmatpush.bf16.msra.mxu1 %v175_v14  ;;  %581 = vmatpush.bf16.msra.mxu2 %v175_v14 }
  0xb6   :  { %582 = vmatpush.bf16.msrb.mxu3 %v175_v14  ;;  %v245_v22 = vpop.trf.xlu0 }
  0xb7   :  { %v427_v18 = vpop.permute.xlu2 %426 }
  0xb8   :  { %v142_v17 = vpop.f32.mrf.mxu0 }
  0xb9   :  { %255 = vmatpush.bf16.msra.mxu1 %v174_v16  ;;  %583 = vmatpush.bf16.msra.mxu2 %v174_v16  ;;  %v172_v25 = vpack.c.bf16 %v142_v17, %v139_v13 }
  0xba   :  { %584 = vmatpush.bf16.msrb.mxu3 %v174_v16 }
  0xc0   :  { %v145_v19 = vpop.f32.mrf.mxu0 }
  0xc6   :  { %v246_v29 = vpop.trf.xlu0 }
  0xc8   :  { %v148_v23 = vpop.f32.mrf.mxu0 }
  0xc9   :  { %v173_v24 = vpack.c.bf16 %v148_v23, %v145_v19  ;;  %v422_v19 = vpop.permute.xlu1 %421 }
  0xcb   :  { %256 = vmatpush.bf16.msra.mxu1 %v173_v24  ;;  %585 = vmatpush.bf16.msra.mxu2 %v173_v24 }
  0xcc   :  { %586 = vmatpush.bf16.msrb.mxu3 %v173_v24 }
  0xcf   :  { %257 = vmatpush.bf16.msra.mxu1 %v172_v25  ;;  %587 = vmatpush.bf16.msra.mxu2 %v172_v25 }
  0xd0   :  { %588 = vmatpush.bf16.msrb.mxu3 %v172_v25  ;;  %v437_v25 = vpop.permute.xlu2 %436 }
  0xd1   :  { %v432_v26 = vpop.permute.xlu1 %431 }
  0xd3   :  { %258 = vmatpush.bf16.msra.mxu1 %v171_v28  ;;  %589 = vmatpush.bf16.msra.mxu2 %v171_v28 }
  0xd4   :  { %590 = vmatpush.bf16.msrb.mxu3 %v171_v28 }
  0xd6   :  { %v247_v33 = vpop.trf.xlu0 }
  0xd7   :  { %259 = vmatpush.bf16.msra.mxu1 %v170_v30  ;;  %591 = vmatpush.bf16.msra.mxu2 %v170_v30 }
  0xd8   :  { %592 = vmatpush.bf16.msrb.mxu3 %v170_v30  ;;  %v447_v32 = vpop.permute.xlu2 %446 }
  0xdb   :  { %260 = vmatpush.bf16.msra.mxu1 %v736_v0  ;;  %593 = vmatpush.bf16.msra.mxu2 %v736_v0 }
  0xdc   :  { %594 = vmatpush.bf16.msrb.mxu3 %v736_v0 }
  0xde   :  { %261 = vmatmul.bf16.vlgmr.msra.gmra.mxu1 %v245_v22 }
  0xe1   :  { %601 = vset.pattern.permute.xlu0 %v628_v10 }
  0xe6   :  { %v248_v36 = vpop.trf.xlu0 }
  0xe7   :  { %276 = vmatmul.bf16.vlgmr.msra.gmra.mxu2 %v248_v36 }
  0xee   :  { %266 = vmatmul.bf16.gmra.mxu1 %v246_v29 }
  0xf6   :  { %v249_v40 = vpop.trf.xlu0 }
  0xf7   :  { %281 = vmatmul.bf16.gmra.mxu2 %v249_v40 }
  0xfe   :  { %271 = vmatmul.bf16.gmra.mxu1 %v247_v33  ;;  %v442_v33 = vpop.permute.xlu1 %441 }
 0x106   :  { %v250_v43 = vpop.trf.xlu0 }
 0x107   :  { %286 = vmatmul.bf16.gmra.mxu2 %v250_v43 }
 0x116   :  { %v251_v44 = vpop.trf.xlu0 }
 0x117   :  { %291 = vmatmul.bf16.gmra.mxu2 %v251_v44 }
 0x126   :  { %v252_v45 = vpop.trf.xlu0 }
 0x127   :  { %296 = vmatmul.bf16.vlgmr.msrb.gmra.mxu3 %v252_v45 }
 0x15b   :  { %v262_v49 = vpop.f32.mrf.mxu1 }
 0x15c   :  { %v449_v52 = vmul.f32 %v372_v46, %v262_v49 }
 0x163   :  { %v264_v51 = vpop.f32.mrf.mxu1 }
 0x164   :  { %v450_v53 = vmul.f32 %v377_v48, %v264_v51 }
 0x166   :  { %v534_v55 = vpack.c.bf16 %v450_v53, %v449_v52 }
 0x168   :  { %535 = vst [vmem:[#allocation3] sm:$0xff] %v534_v55  }
 0x16a   :  { %v277_v57 = vpop.f32.mrf.mxu2 }
 0x16b   :  { %v267_v58 = vpop.f32.mrf.mxu1  ;;  %v455_v60 = vmul.f32 %v402_v59, %v277_v57 }
 0x16c   :  { %v451_v1 = vmul.f32 %v382_v47, %v267_v58 }
 0x172   :  { %v279_v62 = vpop.f32.mrf.mxu2 }
 0x173   :  { %v456_v63 = vmul.f32 %v407_v61, %v279_v62  ;;  %v269_v0 = vpop.f32.mrf.mxu1 }
 0x174   :  { %v452_v3 = vmul.f32 %v387_v50, %v269_v0 }
 0x175   :  { %v549_v2 = vpack.c.bf16 %v456_v63, %v455_v60 }
 0x176   :  { %v539_v4 = vpack.c.bf16 %v452_v3, %v451_v1 }
 0x177   :  { %573 = vst [vmem:[#allocation3 + $0x18] sm:$0xff] %v549_v2  }
 0x178   :  { %571 = vst [vmem:[#allocation3 + $0x8] sm:$0xff] %v539_v4  }
 0x17a   :  { %v282_v5 = vpop.f32.mrf.mxu2 }
 0x17b   :  { %v272_v6 = vpop.f32.mrf.mxu1  ;;  %v457_v10 = vmul.f32 %v412_v8, %v282_v5 }
 0x17c   :  { %v453_v13 = vmul.f32 %v392_v54, %v272_v6 }
 0x182   :  { %v284_v9 = vpop.f32.mrf.mxu2 }
 0x183   :  { %v458_v11 = vmul.f32 %v417_v7, %v284_v9  ;;  %v274_v12 = vpop.f32.mrf.mxu1 }
 0x184   :  { %v454_v15 = vmul.f32 %v397_v56, %v274_v12 }
 0x185   :  { %v554_v14 = vpack.c.bf16 %v458_v11, %v457_v10 }
 0x186   :  { %v544_v16 = vpack.c.bf16 %v454_v15, %v453_v13 }
 0x187   :  { %574 = vst [vmem:[#allocation3 + $0x20] sm:$0xff] %v554_v14  }
 0x188   :  { %572 = vst [vmem:[#allocation3 + $0x10] sm:$0xff] %v544_v16  }
 0x18a   :  { %v287_v17 = vpop.f32.mrf.mxu2 }
 0x18b   :  { %v459_v21 = vmul.f32 %v422_v19, %v287_v17 }
 0x192   :  { %v289_v20 = vpop.f32.mrf.mxu2 }
 0x193   :  { %v460_v22 = vmul.f32 %v427_v18, %v289_v20 }
 0x195   :  { %v559_v23 = vpack.c.bf16 %v460_v22, %v459_v21 }
 0x197   :  { %575 = vst [vmem:[#allocation3 + $0x28] sm:$0xff] %v559_v23  }
 0x19a   :  { %v292_v24 = vpop.f32.mrf.mxu2 }
 0x19b   :  { %v461_v28 = vmul.f32 %v432_v26, %v292_v24 }
 0x1a2   :  { %v294_v27 = vpop.f32.mrf.mxu2 }
 0x1a3   :  { %v462_v29 = vmul.f32 %v437_v25, %v294_v27 }
 0x1a5   :  { %v564_v30 = vpack.c.bf16 %v462_v29, %v461_v28 }
 0x1a7   :  { %576 = vst [vmem:[#allocation3 + $0x30] sm:$0xff] %v564_v30  }
 0x1aa   :  { %v297_v31 = vpop.f32.mrf.mxu3 }
 0x1ab   :  { %v463_v35 = vmul.f32 %v442_v33, %v297_v31 }
 0x1b2   :  { %v299_v34 = vpop.f32.mrf.mxu3 }
 0x1b3   :  { %v464_v36 = vmul.f32 %v447_v32, %v299_v34 }
 0x1b5   :  { %v569_v37 = vpack.c.bf16 %v464_v36, %v463_v35 }
 0x1b7   :  { %577 = vst [vmem:[#allocation3 + $0x38] sm:$0xff] %v569_v37  }
 0x1b8   :  { %509 = dma.vmem_to_hbm [thread:$0]  %s502_s30, 1024, %s504_s7, [#allocation4], %s630_s8, %s630_s8, %s631_s9  }
 0x1b9   :  { %626 = dma.done.wait [#allocation4], 1024  }
 0x1ba   :  { %627 = vsyncadd [#allocation4], 4294966272 }
 0x1bb   :  { %514 = vsyncpa [#allocation4], 1 }

</bundles_post_ra>
